<compile_context>
chip_gen: v5e
topology: v5e:2x2
jax: 0.10.0
libtpu: 0.0.40
codegen_flags: <defaults>
</compile_context>

<pallas_src>
import functools

import jax
import jax.numpy as jnp
from jax.experimental import pallas as pl
from jax.experimental.pallas import tpu as pltpu

BN_EPS = 1e-5


def _fused_mlp_kernel(*refs, n_layers: int, batch_norm: bool, mxu_dtype):
    """Fused forward of the whole MLP (no grid; whole-array VMEM refs).

    refs = (x_ref, w_0, p_0, w_1, p_1, ..., w_{L-1}, p_{L-1}, o_ref)

      x_ref : (B, d0)          input activations (unpadded)
      w_l   : (d_in, d_out)    layer weight, pre-transposed, stored in mxu_dtype
      p_l   : (2, d_out) = [gamma; beta]  if batch_norm  (f32)
              (1, d_out) = [bias]         otherwise      (f32)
      o_ref : (B, d_last)
    """
    x_ref = refs[0]
    o_ref = refs[-1]
    layer_refs = refs[1:-1]

    h = x_ref[...].astype(jnp.float32)
    for l in range(n_layers):
        w = layer_refs[2 * l][...]                       # already mxu_dtype
        p = layer_refs[2 * l + 1][...].astype(jnp.float32)

        # MXU matmul: bf16 x bf16 -> f32 accumulate (native on v5e/v6e/v7x).
        # Bias is omitted when BN follows: batch-mean subtraction cancels it.
        y = jnp.dot(h.astype(mxu_dtype), w, preferred_element_type=jnp.float32)

        if batch_norm:
            gamma = p[0:1, :]
            beta = p[1:2, :]
            # Training-mode BatchNorm1d: batch mean, biased variance, eps=1e-5.
            # Centered two-pass form (numerically safe).  For training-sized
            # batches this could be cut to a single sum/sum-of-squares pass.
            mean = jnp.mean(y, axis=0, keepdims=True)            # XLU reduce
            centered = y - mean
            var = jnp.mean(centered * centered, axis=0, keepdims=True)
            scale = gamma * jax.lax.rsqrt(var + BN_EPS)          # EUP rsqrt
            y = centered * scale + beta                          # fused VPU pass
        else:
            y = y + p[0:1, :]

        if l != n_layers - 1:
            y = jnp.maximum(y, 0.0)
        h = y

    o_ref[...] = h.astype(o_ref.dtype)


def _vmem_limit_bytes(args, out_bytes, max_dim, batch):
    """Generation-aware scoped-VMEM limit (single-buffered operands + margin)."""
    io_bytes = sum(int(a.size) * a.dtype.itemsize for a in args) + int(out_bytes)
    # a few live f32 (B, max_d) intermediates + fixed margin for Mosaic scratch
    needed = io_bytes + 4 * int(batch) * int(max_dim) * 4 + (4 << 20)
    try:
        vmem_cap = int(pltpu.get_tpu_info().vmem_capacity_bytes)
    except Exception:
        vmem_cap = 64 << 20  # v7x-sized conservative fallback
    cap = max(vmem_cap - (8 << 20), 16 << 20)   # leave headroom below physical
    return int(min(max(needed, 32 << 20), cap))


def fused_mlp_forward(x, layer_params, *, batch_norm: bool,
                      mxu_dtype=jnp.bfloat16):
    """Run the fused MLP as one Pallas kernel.  The whole batch stays resident
    in VMEM (BatchNorm needs the full batch axis)."""
    B = x.shape[0]
    n_layers = len(layer_params)
    d_last = layer_params[-1][0].shape[1]

    args = [x]
    max_dim = x.shape[1]
    for w, p in layer_params:
        args.append(w)
        args.append(p)
        max_dim = max(max_dim, w.shape[0], w.shape[1])

    out_struct = jax.ShapeDtypeStruct((B, d_last), x.dtype)
    vmem_limit = _vmem_limit_bytes(
        args, B * d_last * jnp.dtype(x.dtype).itemsize, max_dim, B)

    kernel = functools.partial(_fused_mlp_kernel, n_layers=n_layers,
                               batch_norm=batch_norm, mxu_dtype=mxu_dtype)

    # No grid, no BlockSpecs: every operand is one whole-array VMEM block,
    # single-buffered (nothing to pipeline for a single step).
    return pl.pallas_call(
        kernel,
        out_shape=out_struct,
        compiler_params=pltpu.CompilerParams(vmem_limit_bytes=vmem_limit),
    )(*args)


class PallasMLP:
    """JAX/Pallas port of the GEARS MLP."""

    def __init__(self, sizes, batch_norm=True, last_layer_act='linear', *,
                 key=None, dtype=jnp.float32, mxu_dtype=jnp.bfloat16):
        if key is None:
            key = jax.random.PRNGKey(0)
        self.sizes = list(sizes)
        self.batch_norm = batch_norm
        self.activation = last_layer_act  # stored, unused in forward (matches PyTorch)
        self.dtype = dtype
        self.mxu_dtype = mxu_dtype

        self.params = []          # f32 master copies (used by the reference)
        self._kernel_params = []  # kernel inputs: (w[mxu_dtype], packed gamma/beta or bias)
        n_layers = len(sizes) - 1
        for s in range(n_layers):
            d_in, d_out = sizes[s], sizes[s + 1]
            key, kw, kb = jax.random.split(key, 3)
            bound = 1.0 / float(d_in) ** 0.5
            # PyTorch nn.Linear default init: U(-1/sqrt(fan_in), 1/sqrt(fan_in));
            # weight stored pre-transposed as (d_in, d_out).
            w = jax.random.uniform(kw, (d_in, d_out), dtype=dtype,
                                   minval=-bound, maxval=bound)
            b = jax.random.uniform(kb, (d_out,), dtype=dtype,
                                   minval=-bound, maxval=bound)
            gamma = jnp.ones((d_out,), dtype=dtype)
            beta = jnp.zeros((d_out,), dtype=dtype)
            self.params.append((w, b, gamma, beta))

            w_k = w.astype(mxu_dtype)
            if batch_norm:
                # Linear bias dropped: BN's per-feature mean subtraction cancels it.
                p_k = jnp.stack([gamma, beta], axis=0).astype(jnp.float32)   # (2, d_out)
            else:
                p_k = b[None, :].astype(jnp.float32)                         # (1, d_out)
            self._kernel_params.append((w_k, p_k))

    def __call__(self, x):
        # NOTE: if callers run many small independent forwards, stack them along
        # the batch axis into one call so the MXU M dimension is >= 128/256.
        return fused_mlp_forward(x, self._kernel_params,
                                 batch_norm=self.batch_norm,
                                 mxu_dtype=self.mxu_dtype)


def _reference_forward(mlp: PallasMLP, x):
    """Pure-JAX reference, faithful to the PyTorch module (training-mode BN,
    bias kept).  Matmuls use the same MXU dtype as the kernel so the check
    isolates kernel correctness rather than bf16-vs-f32 drift."""
    n_layers = len(mlp.params)
    y = x.astype(jnp.float32)
    for idx, (w, b, gamma, beta) in enumerate(mlp.params):
        y = jnp.dot(y.astype(mlp.mxu_dtype), w.astype(mlp.mxu_dtype),
                    preferred_element_type=jnp.float32) + b.astype(jnp.float32)
        if mlp.batch_norm:
            mean = jnp.mean(y, axis=0, keepdims=True)
            var = jnp.mean((y - mean) ** 2, axis=0, keepdims=True)
            y = (y - mean) * jax.lax.rsqrt(var + BN_EPS)
            y = y * gamma.astype(jnp.float32) + beta.astype(jnp.float32)
        if idx != n_layers - 1:
            y = jnp.maximum(y, 0.0)
    return y.astype(x.dtype)


if __name__ == "__main__":
    key = jax.random.PRNGKey(0)
    k_in, k_params = jax.random.split(key)

    batch = 16
    sizes = [32, 64, 32]  # small MLP: 32 -> 64 -> 32

    x = jax.random.normal(k_in, (batch, sizes[0]), dtype=jnp.float32)

    # batch_norm=True path (default GEARS config): Linear->BN->ReLU, Linear->BN
    mlp = PallasMLP(sizes, batch_norm=True, last_layer_act='linear', key=k_params)
    out = jax.block_until_ready(mlp(x))
    ref = _reference_forward(mlp, x)
    assert out.shape == (batch, sizes[-1])
    assert jnp.allclose(out, ref, atol=2e-3, rtol=2e-3), "mismatch vs JAX reference (BN)"

    # batch_norm=False path: Linear -> ReLU -> Linear
    mlp_nobn = PallasMLP(sizes, batch_norm=False, last_layer_act='linear', key=k_params)
    out2 = jax.block_until_ready(mlp_nobn(x))
    ref2 = _reference_forward(mlp_nobn, x)
    assert out2.shape == (batch, sizes[-1])
    assert jnp.allclose(out2, ref2, atol=2e-3, rtol=2e-3), "mismatch vs JAX reference (no BN)"

    print("KERNEL_OK")
</pallas_src>

<mosaic_0001>
module attributes {stable_mosaic.version = 11 : i64} {
  func.func @_fused_mlp_kernel(%arg0: memref<16x32xf32, #tpu.memory_space<vmem>>, %arg1: memref<32x64xbf16, #tpu.memory_space<vmem>>, %arg2: memref<2x64xf32, #tpu.memory_space<vmem>>, %arg3: memref<64x32xbf16, #tpu.memory_space<vmem>>, %arg4: memref<2x32xf32, #tpu.memory_space<vmem>>, %arg5: memref<16x32xf32, #tpu.memory_space<vmem>>) attributes {dimension_semantics = [], scalar_prefetch = 0 : i64, scratch_operands = 0 : i64, tpu.core_type = #tpu.core_type<tc>} {
    %c0 = arith.constant 0 : index
    %c0_0 = arith.constant 0 : index
    %0 = vector.load %arg0[%c0, %c0_0] : memref<16x32xf32, #tpu.memory_space<vmem>>, vector<16x32xf32>
    %c0_1 = arith.constant 0 : index
    %c0_2 = arith.constant 0 : index
    %1 = vector.load %arg1[%c0_1, %c0_2] : memref<32x64xbf16, #tpu.memory_space<vmem>>, vector<32x64xbf16>
    %c0_3 = arith.constant 0 : index
    %c0_4 = arith.constant 0 : index
    %2 = vector.load %arg2[%c0_3, %c0_4] : memref<2x64xf32, #tpu.memory_space<vmem>>, vector<2x64xf32>
    %3 = arith.truncf %0 : vector<16x32xf32> to vector<16x32xbf16>
    %cst = arith.constant dense<0.000000e+00> : vector<16x64xf32>
    %4 = tpu.matmul %3, %1, %cst {dimension_numbers = #tpu.dot_dimension_numbers<[1], [0], [0], [1], [0, 0, 1, 1], [], []>} : vector<16x32xbf16>, vector<32x64xbf16>, vector<16x64xf32> -> vector<16x64xf32>
    %5 = vector.extract_strided_slice %2 {offsets = [0, 0], sizes = [1, 64], strides = [1, 1]} : vector<2x64xf32> to vector<1x64xf32>
    %6 = vector.extract_strided_slice %2 {offsets = [1, 0], sizes = [1, 64], strides = [1, 1]} : vector<2x64xf32> to vector<1x64xf32>
    %cst_5 = arith.constant dense<0.000000e+00> : vector<64xf32>
    %7 = vector.multi_reduction <add>, %4, %cst_5 [0] : vector<16x64xf32> to vector<64xf32>
    %8 = vector.shape_cast %7 : vector<64xf32> to vector<1x64xf32>
    %cst_6 = arith.constant 1.600000e+01 : f32
    %9 = vector.broadcast %cst_6 : f32 to vector<1x64xf32>
    %10 = arith.divf %8, %9 : vector<1x64xf32>
    %11 = vector.broadcast %10 : vector<1x64xf32> to vector<16x64xf32>
    %12 = arith.subf %4, %11 : vector<16x64xf32>
    %13 = arith.mulf %12, %12 : vector<16x64xf32>
    %cst_7 = arith.constant dense<0.000000e+00> : vector<64xf32>
    %14 = vector.multi_reduction <add>, %13, %cst_7 [0] : vector<16x64xf32> to vector<64xf32>
    %15 = vector.shape_cast %14 : vector<64xf32> to vector<1x64xf32>
    %cst_8 = arith.constant 1.600000e+01 : f32
    %16 = vector.broadcast %cst_8 : f32 to vector<1x64xf32>
    %17 = arith.divf %15, %16 : vector<1x64xf32>
    %cst_9 = arith.constant 9.99999974E-6 : f32
    %18 = vector.broadcast %cst_9 : f32 to vector<1x64xf32>
    %19 = arith.addf %17, %18 : vector<1x64xf32>
    %20 = math.rsqrt %19 : vector<1x64xf32>
    %21 = arith.mulf %5, %20 : vector<1x64xf32>
    %22 = vector.broadcast %21 : vector<1x64xf32> to vector<16x64xf32>
    %23 = arith.mulf %12, %22 : vector<16x64xf32>
    %24 = vector.broadcast %6 : vector<1x64xf32> to vector<16x64xf32>
    %25 = arith.addf %23, %24 : vector<16x64xf32>
    %cst_10 = arith.constant 0.000000e+00 : f32
    %26 = vector.broadcast %cst_10 : f32 to vector<16x64xf32>
    %27 = arith.maximumf %25, %26 : vector<16x64xf32>
    %c0_11 = arith.constant 0 : index
    %c0_12 = arith.constant 0 : index
    %28 = vector.load %arg3[%c0_11, %c0_12] : memref<64x32xbf16, #tpu.memory_space<vmem>>, vector<64x32xbf16>
    %c0_13 = arith.constant 0 : index
    %c0_14 = arith.constant 0 : index
    %29 = vector.load %arg4[%c0_13, %c0_14] : memref<2x32xf32, #tpu.memory_space<vmem>>, vector<2x32xf32>
    %30 = arith.truncf %27 : vector<16x64xf32> to vector<16x64xbf16>
    %cst_15 = arith.constant dense<0.000000e+00> : vector<16x32xf32>
    %31 = tpu.matmul %30, %28, %cst_15 {dimension_numbers = #tpu.dot_dimension_numbers<[1], [0], [0], [1], [0, 0, 1, 1], [], []>} : vector<16x64xbf16>, vector<64x32xbf16>, vector<16x32xf32> -> vector<16x32xf32>
    %32 = vector.extract_strided_slice %29 {offsets = [0, 0], sizes = [1, 32], strides = [1, 1]} : vector<2x32xf32> to vector<1x32xf32>
    %33 = vector.extract_strided_slice %29 {offsets = [1, 0], sizes = [1, 32], strides = [1, 1]} : vector<2x32xf32> to vector<1x32xf32>
    %cst_16 = arith.constant dense<0.000000e+00> : vector<32xf32>
    %34 = vector.multi_reduction <add>, %31, %cst_16 [0] : vector<16x32xf32> to vector<32xf32>
    %35 = vector.shape_cast %34 : vector<32xf32> to vector<1x32xf32>
    %cst_17 = arith.constant 1.600000e+01 : f32
    %36 = vector.broadcast %cst_17 : f32 to vector<1x32xf32>
    %37 = arith.divf %35, %36 : vector<1x32xf32>
    %38 = vector.broadcast %37 : vector<1x32xf32> to vector<16x32xf32>
    %39 = arith.subf %31, %38 : vector<16x32xf32>
    %40 = arith.mulf %39, %39 : vector<16x32xf32>
    %cst_18 = arith.constant dense<0.000000e+00> : vector<32xf32>
    %41 = vector.multi_reduction <add>, %40, %cst_18 [0] : vector<16x32xf32> to vector<32xf32>
    %42 = vector.shape_cast %41 : vector<32xf32> to vector<1x32xf32>
    %cst_19 = arith.constant 1.600000e+01 : f32
    %43 = vector.broadcast %cst_19 : f32 to vector<1x32xf32>
    %44 = arith.divf %42, %43 : vector<1x32xf32>
    %cst_20 = arith.constant 9.99999974E-6 : f32
    %45 = vector.broadcast %cst_20 : f32 to vector<1x32xf32>
    %46 = arith.addf %44, %45 : vector<1x32xf32>
    %47 = math.rsqrt %46 : vector<1x32xf32>
    %48 = arith.mulf %32, %47 : vector<1x32xf32>
    %49 = vector.broadcast %48 : vector<1x32xf32> to vector<16x32xf32>
    %50 = arith.mulf %39, %49 : vector<16x32xf32>
    %51 = vector.broadcast %33 : vector<1x32xf32> to vector<16x32xf32>
    %52 = arith.addf %50, %51 : vector<16x32xf32>
    %c0_21 = arith.constant 0 : index
    %c0_22 = arith.constant 0 : index
    %53 = vector.load %arg5[%c0_21, %c0_22] : memref<16x32xf32, #tpu.memory_space<vmem>>, vector<16x32xf32>
    tpu.vector_store %arg5[%c0_21, %c0_22], %52 {strides = array<i32>} : memref<16x32xf32, #tpu.memory_space<vmem>>, vector<16x32xf32>,
    return
  }
}

</mosaic_0001>

<bundles_post_ra>
// kernel: tpu_custom_call.1
= control target key start
LH: loop header
LB: loop body
LE: loop exit
PB: predicated region body
PF: predicated region fallthrough
CT: control target
= control target key end

     0   :  { %s378_s0 = inlined_call_operand.vmem [shape: f32[16,32], index: 0, kind: input, shape index: {}]   ;;  %s379_s1 = inlined_call_operand.vmem [shape: bf16[32,64], index: 1, kind: input, shape index: {}]   ;;  %s380_s2 = inlined_call_operand.vmem [shape: f32[2,64], index: 2, kind: input, shape index: {}]   ;;  %s381_s3 = inlined_call_operand.vmem [shape: bf16[64,32], index: 3, kind: input, shape index: {}]   ;;  %s382_s4 = inlined_call_operand.vmem [shape: f32[2,32], index: 4, kind: input, shape index: {}]   ;;  %s383_s5 = inlined_call_operand.hbm [shape: f32[16,32], index: 5, kind: output, shape index: {}]  }
   0x1   :  { %v252_v0 = vld [vmem:[%s379_s1 + $0x8] sm:$0xff] }
   0x2   :  { %10 = vsyncpa [#allocation3], 0  ;;  %52 = vmatpush.bf16.msra.mxu0 %v252_v0  ;;  %v251_v1 = vld [vmem:[%s379_s1] sm:$0xff]  ;;  %v23_v3 = vld [vmem:[%s378_s0 + $0x8] sm:$0xff]  ;;  %vm42_vm0 = vcmask 261120   ;;  %v293_v5 = vmov 16.0  }
   0x3   :  { %v22_v2 = vld [vmem:[%s378_s0] sm:$0xff]  ;;  %261 = vrcp.f32 %v293_v5  ;;  %vm60_vm1 = vcmask 523264   ;;  %v256_v30 = vld [vmem:[%s381_s3 + $0x18] sm:$0xff]  ;;  %v255_v33 = vld [vmem:[%s381_s3 + $0x10] sm:$0xff]  ;;  %s294_s9 = smov [#allocation2]   ;;  %s213_s13 = sshll.u32 %s383_s5, 4  ;;  %s214_s13 = int_to_ptr.hbm [resolvable:$true] %s213_s13 }
   0x4   :  { %v29_v4 = vpack.c.bf16 %v23_v3, %v22_v2  ;;  %153 = vmatpush.bf16.msra.mxu1 %v256_v30  ;;  %v254_v36 = vld [vmem:[%s381_s3 + $0x8] sm:$0xff]  ;;  %v253_v39 = vld [vmem:[%s381_s3] sm:$0xff]  ;;  %s211_s10 = sshll.u32 %s294_s9, 4  ;;  %s296_s14 = smov 8   ;;  %s212_s10 = int_to_ptr.vmem [resolvable:$true] %s211_s10 }
   0x5   :  { %v28_v48 = vld [vmem:[%s380_s2] sm:$0x3] }
   0x6   :  { %53 = vmatpush.bf16.msra.mxu0 %v251_v1  ;;  %v107_v53 = vperm.slane %v28_v48, 1  ;;  %v120_v30 = vld [vmem:[%s382_s4] sm:$0x3]  ;;  %s295_s4 = smov 128  }
   0x8   :  { %154 = vmatpush.bf16.msra.mxu1 %v255_v33 }
   0x9   :  { %233 = vmatmul.msk.bf16.vlgmr.msra.gmra.mxu0 %vm42_vm0, %v29_v4  ;;  %v262_v7 = vpop.eup %261 }
   0xa   :  { %v71_v8 = vmul.f32 16.0, %v262_v7  ;;  %vm75_vm2 = vweird.f32 %v262_v7 }
   0xc   :  { %v72_v12 = vsub.f32 1.0, %v71_v8  ;;  %155 = vmatpush.bf16.msra.mxu1 %v254_v36 }
   0xe   :  { %v73_v15 = vmul.f32 %v262_v7, %v72_v12 }
  0x10   :  { %v74_v18 = vadd.f32 %v262_v7, %v73_v15  ;;  %156 = vmatpush.bf16.msra.mxu1 %v253_v39 }
  0x12   :  { %v342_v21 = vsel %vm75_vm2, %v262_v7, %v74_v18 }
  0x86   :  { %v55_v6 = vpop.f32.mrf.mxu0 }
  0x87   :  { %v61_v10 = vsel %vm60_vm1, %v55_v6, 0.0 }
  0x8e   :  { %v57_v9 = vpop.f32.mrf.mxu0 }
  0x8f   :  { %v62_v11 = vsel %vm60_vm1, %v57_v9, 0.0 }
  0x90   :  { %v63_v13 = vadd.f32 %v62_v11, %v61_v10 }
  0x92   :  { %v64_v14 = vrot.slane %v63_v13, 4 }
  0x94   :  { %v65_v16 = vadd.f32 %v64_v14, %v63_v13 }
  0x96   :  { %v66_v17 = vrot.slane %v65_v16, 2 }
  0x98   :  { %v67_v19 = vadd.f32 %v66_v17, %v65_v16 }
  0x9a   :  { %v68_v20 = vrot.slane %v67_v19, 1 }
  0x9c   :  { %v69_v22 = vadd.f32 %v68_v20, %v67_v19 }
  0x9e   :  { %v77_v23 = vmul.f32 %v342_v21, %v69_v22 }
  0xa0   :  { %v78_v24 = vsub.f32 %v55_v6, %v77_v23  ;;  %v79_v25 = vsub.f32 %v57_v9, %v77_v23 }
  0xa2   :  { %v80_v26 = vmul.f32 %v78_v24, %v78_v24  ;;  %v81_v27 = vmul.f32 %v79_v25, %v79_v25 }
  0xa4   :  { %v82_v28 = vsel %vm60_vm1, %v80_v26, 0.0  ;;  %v83_v29 = vsel %vm60_vm1, %v81_v27, 0.0 }
  0xa5   :  { %v84_v31 = vadd.f32 %v83_v29, %v82_v28 }
  0xa7   :  { %v85_v32 = vrot.slane %v84_v31, 4 }
  0xa9   :  { %v86_v34 = vadd.f32 %v85_v32, %v84_v31 }
  0xab   :  { %v87_v35 = vrot.slane %v86_v34, 2 }
  0xad   :  { %v88_v37 = vadd.f32 %v87_v35, %v86_v34  ;;  %v202_v35 = vperm.slane %v120_v30, 1 }
  0xaf   :  { %v89_v38 = vrot.slane %v88_v37, 1 }
  0xb1   :  { %v90_v40 = vadd.f32 %v89_v38, %v88_v37 }
  0xb3   :  { %v91_v41 = vmul.f32 %v90_v40, %v342_v21 }
  0xb5   :  { %v92_v42 = vadd.f32 1e-05, %v91_v41 }
  0xb7   :  { %263 = vrsqrt.f32 %v92_v42  ;;  %vm99_vm4 = vweird.f32 %v92_v42 }
  0xbd   :  { %v264_v43 = vpop.eup %263 }
  0xbe   :  { %v94_v44 = vmul.f32 %v264_v43, %v92_v42  ;;  %vm100_vm3 = vweird.f32 %v264_v43 }
  0xbf   :  { %vm101_vm5 = vmor %vm99_vm4, %vm100_vm3 }
  0xc0   :  { %v95_v45 = vmul.f32 %v264_v43, %v94_v44 }
  0xc2   :  { %v96_v46 = vmul.f32 0.5, %v95_v45 }
  0xc4   :  { %v97_v47 = vsub.f32 1.5, %v96_v46 }
  0xc6   :  { %v98_v49 = vmul.f32 %v264_v43, %v97_v47 }
  0xc8   :  { %v102_v50 = vsel %vm101_vm5, %v264_v43, %v98_v49 }
  0xc9   :  { %v103_v51 = vmul.f32 %v102_v50, %v28_v48 }
  0xcb   :  { %v104_v52 = vperm.slane %v103_v51, 0 }
  0xcd   :  { %v105_v54 = vmul.f32 %v104_v52, %v78_v24  ;;  %v106_v55 = vmul.f32 %v104_v52, %v79_v25 }
  0xcf   :  { %v109_v56 = vadd.f32 %v107_v53, %v106_v55  ;;  %v108_v57 = vadd.f32 %v107_v53, %v105_v54 }
  0xd1   :  { %v111_v58 = vmax.f32 %v109_v56, 0.0  ;;  %v110_v59 = vmax.f32 %v108_v57, 0.0 }
  0xd3   :  { %v121_v60 = vpack.c.bf16 %v111_v58, %v110_v59 }
  0xd5   :  { %250 = vmatmul.msk.bf16.vlgmr.msra.gmra.mxu1 %vm60_vm1, %v121_v60 }
 0x152   :  { %v158_v61 = vpop.f32.mrf.mxu1 }
 0x153   :  { %v163_v63 = vsel %vm42_vm0, %v158_v61, 0.0 }
 0x15a   :  { %v160_v62 = vpop.f32.mrf.mxu1 }
 0x15b   :  { %v164_v0 = vsel %vm42_vm0, %v160_v62, 0.0 }
 0x15c   :  { %v165_v1 = vadd.f32 %v164_v0, %v163_v63 }
 0x15e   :  { %v166_v2 = vrot.slane %v165_v1, 4 }
 0x160   :  { %v167_v3 = vadd.f32 %v166_v2, %v165_v1 }
 0x162   :  { %v168_v4 = vrot.slane %v167_v3, 2 }
 0x164   :  { %v169_v5 = vadd.f32 %v168_v4, %v167_v3 }
 0x166   :  { %v170_v6 = vrot.slane %v169_v5, 1 }
 0x168   :  { %v171_v7 = vadd.f32 %v170_v6, %v169_v5 }
 0x16a   :  { %v172_v8 = vmul.f32 %v171_v7, %v342_v21 }
 0x16c   :  { %v173_v9 = vsub.f32 %v158_v61, %v172_v8  ;;  %v174_v10 = vsub.f32 %v160_v62, %v172_v8 }
 0x16e   :  { %v175_v11 = vmul.f32 %v173_v9, %v173_v9  ;;  %v176_v12 = vmul.f32 %v174_v10, %v174_v10 }
 0x170   :  { %v177_v13 = vsel %vm42_vm0, %v175_v11, 0.0  ;;  %v178_v14 = vsel %vm42_vm0, %v176_v12, 0.0 }
 0x171   :  { %v179_v15 = vadd.f32 %v178_v14, %v177_v13 }
 0x173   :  { %v180_v16 = vrot.slane %v179_v15, 4 }
 0x175   :  { %v181_v17 = vadd.f32 %v180_v16, %v179_v15 }
 0x177   :  { %v182_v18 = vrot.slane %v181_v17, 2 }
 0x179   :  { %v183_v19 = vadd.f32 %v182_v18, %v181_v17 }
 0x17b   :  { %v184_v20 = vrot.slane %v183_v19, 1 }
 0x17d   :  { %v185_v22 = vadd.f32 %v184_v20, %v183_v19 }
 0x17f   :  { %v186_v23 = vmul.f32 %v185_v22, %v342_v21 }
 0x181   :  { %v187_v24 = vadd.f32 1e-05, %v186_v23 }
 0x183   :  { %265 = vrsqrt.f32 %v187_v24  ;;  %vm194_vm7 = vweird.f32 %v187_v24 }
 0x189   :  { %v266_v25 = vpop.eup %265 }
 0x18a   :  { %v189_v26 = vmul.f32 %v266_v25, %v187_v24  ;;  %vm195_vm6 = vweird.f32 %v266_v25 }
 0x18b   :  { %vm196_vm8 = vmor %vm194_vm7, %vm195_vm6 }
 0x18c   :  { %v190_v27 = vmul.f32 %v266_v25, %v189_v26 }
 0x18e   :  { %v191_v28 = vmul.f32 0.5, %v190_v27 }
 0x190   :  { %v192_v29 = vsub.f32 1.5, %v191_v28 }
 0x192   :  { %v193_v31 = vmul.f32 %v266_v25, %v192_v29 }
 0x194   :  { %v197_v32 = vsel %vm196_vm8, %v266_v25, %v193_v31 }
 0x195   :  { %v198_v33 = vmul.f32 %v197_v32, %v120_v30 }
 0x197   :  { %v199_v34 = vperm.slane %v198_v33, 0 }
 0x199   :  { %v200_v21 = vmul.f32 %v199_v34, %v173_v9  ;;  %v201_v36 = vmul.f32 %v199_v34, %v174_v10 }
 0x19b   :  { %v203_v37 = vadd.f32 %v202_v35, %v200_v21  ;;  %v204_v38 = vadd.f32 %v202_v35, %v201_v36 }
 0x19d   :  { %205 = vst.msk [vmem:[#allocation2] sm:$0xff] %vm42_vm0, %v203_v37 }
 0x19e   :  { %206 = vst.msk [vmem:[#allocation2 + $0x8] sm:$0xff] %vm42_vm0, %v204_v38 }
 0x19f   :  { %219 = dma.vmem_to_hbm [thread:$0]  %s212_s10, 256, %s214_s13, [#allocation3], %s295_s4, %s295_s4, %s296_s14  }
 0x1a0   :  { %291 = dma.done.wait [#allocation3], 256  }
 0x1a1   :  { %292 = vsyncadd [#allocation3], 4294967040 }
 0x1a2   :  { %224 = vsyncpa [#allocation3], 1 }

</bundles_post_ra>
